<compile_context>
chip_gen: v5e
topology: v5e:2x2
jax: 0.10.0
libtpu: 0.0.40
codegen_flags: <defaults>
</compile_context>

<pallas_src>
import jax
import jax.numpy as jnp
from jax.experimental import pallas as pl
from jax.experimental.pallas import tpu as pltpu

# BatchNorm2d(1) eval-mode constants (fresh init: running_mean=0, running_var=1).
BN_GAMMA = 1.0
BN_BETA = 0.0
BN_MEAN = 0.0
BN_VAR = 1.0
BN_EPS = 1e-5


def _head_kernel(xpad_ref, w_ref, b_ref, o_ref):
    """One (image n, channel c) grid step of Conv2d(C,1,3,p=1) + BN(1) + Sigmoid.

    xpad_ref: (1, 1, H+2, W+2) VMEM  -- zero-padded plane of channel c, image n
    w_ref   : (C*9,)           SMEM  -- BN-folded conv weights, [c, dy, dx] order
    b_ref   : (1,)             SMEM  -- BN-folded conv bias
    o_ref   : (1, H, W)        VMEM  -- accumulator, resident across the c axis
    """
    H = o_ref.shape[1]
    W = o_ref.shape[2]
    c = pl.program_id(1)
    num_c = pl.num_programs(1)

    # Hoist the 9 tap weights (cheap SMEM scalar loads) out of the tap loop.
    base = c * 9
    taps = [w_ref[base + t] for t in range(9)]

    # 3x3 conv for this channel: 9 shifted (H, W) planes * scalar weight.
    # Everything is a full-lane-width VPU op (W on the lane axis); no MXU, no
    # cross-lane reductions.
    acc = jnp.zeros((H, W), dtype=jnp.float32)
    for dy in range(3):
        for dx in range(3):
            patch = xpad_ref[0, 0, dy:dy + H, dx:dx + W].astype(jnp.float32)
            acc = acc + patch * taps[dy * 3 + dx]

    @pl.when(c == 0)
    def _init():
        o_ref[0] = acc + b_ref[0]          # folded conv bias + BN shift

    @pl.when(c > 0)
    def _accumulate():
        o_ref[0] = o_ref[0] + acc

    @pl.when(c == num_c - 1)
    def _finalize():
        o_ref[0] = jax.nn.sigmoid(o_ref[0])


def head_conv_bn_sigmoid(x_nchw, w_oihw, b):
    """Head of RangeMaskNet: Dropout2d(eval) + Conv2d(C,1,3,1,1) + BN(1) + Sigmoid."""
    N, C, H, W = x_nchw.shape

    # Fold eval-mode BatchNorm2d(1) into the conv weight & bias.
    scale = BN_GAMMA / (BN_VAR + BN_EPS) ** 0.5
    w_smem = (w_oihw[0].astype(jnp.float32) * scale).reshape(C * 9)        # (C*9,)
    b_smem = ((b.astype(jnp.float32) - BN_MEAN) * scale + BN_BETA).reshape(1)

    # Single spatial zero-pad; layout stays NCHW so W remains on the lane axis.
    xpad = jnp.pad(x_nchw, ((0, 0), (0, 0), (1, 1), (1, 1)))               # (N,C,H+2,W+2)

    out = pl.pallas_call(
        _head_kernel,
        out_shape=jax.ShapeDtypeStruct((N, H, W), jnp.float32),
        grid=(N, C),
        in_specs=[
            pl.BlockSpec((1, 1, H + 2, W + 2), lambda n, c: (n, c, 0, 0)),
            pl.BlockSpec(memory_space=pltpu.MemorySpace.SMEM),
            pl.BlockSpec(memory_space=pltpu.MemorySpace.SMEM),
        ],
        out_specs=pl.BlockSpec((1, H, W), lambda n, c: (n, 0, 0)),
        compiler_params=pltpu.CompilerParams(
            dimension_semantics=("parallel", "arbitrary"),
            vmem_limit_bytes=32 * 1024 * 1024),
    )(xpad, w_smem, b_smem)

    return out[:, None, :, :]              # back to NCHW: (N, 1, H, W)


def rangemasknet_forward(x_list, w_oihw, b):
    """Forward pass of RangeMaskNet (eval mode)."""
    y = jnp.concatenate(x_list, axis=1)    # torch.cat(x, 1), NCHW
    # TODO(synk): DenseEncoder / DenseDecoder are defined outside the provided
    # source; they are treated as identity maps here.
    y = head_conv_bn_sigmoid(y, w_oihw, b)  # Dropout2d(eval) + Conv + BN + Sigmoid
    return y


def _reference_forward(x_list, w_oihw, b):
    """Pure-JAX reference for correctness checking."""
    y = jnp.concatenate(x_list, axis=1)
    conv = jax.lax.conv_general_dilated(
        y, w_oihw, window_strides=(1, 1), padding="SAME",
        dimension_numbers=("NCHW", "OIHW", "NCHW"))
    conv = conv + b.reshape(1, -1, 1, 1)
    scale = BN_GAMMA / jnp.sqrt(BN_VAR + BN_EPS)
    bn = (conv - BN_MEAN) * scale + BN_BETA
    return jax.nn.sigmoid(bn)


if __name__ == "__main__":
    key = jax.random.PRNGKey(0)
    k1, k2, kw, kb = jax.random.split(key, 4)

    # Two range-image style inputs concatenated along channels.  W is a multiple
    # of 128 (real range images are 512/1024/2048 wide) so output stores are
    # lane-dense.
    N, C1, C2, H, W = 2, 2, 2, 16, 128
    x1 = jax.random.normal(k1, (N, C1, H, W), dtype=jnp.float32)
    x2 = jax.random.normal(k2, (N, C2, H, W), dtype=jnp.float32)
    C = C1 + C2

    # Conv2d(C, 1, kernel_size=3) weight: xavier_normal_ with gain('sigmoid')=1.
    fan_in, fan_out = C * 3 * 3, 1 * 3 * 3
    std = 1.0 * (2.0 / (fan_in + fan_out)) ** 0.5
    w = std * jax.random.normal(kw, (1, C, 3, 3), dtype=jnp.float32)
    # Conv bias (torch default init: U(-1/sqrt(fan_in), 1/sqrt(fan_in))).
    bound = 1.0 / (fan_in ** 0.5)
    b = jax.random.uniform(kb, (1,), minval=-bound, maxval=bound, dtype=jnp.float32)

    out = rangemasknet_forward([x1, x2], w, b)
    out = jax.block_until_ready(out)

    ref = _reference_forward([x1, x2], w, b)
    assert out.shape == (N, 1, H, W), out.shape
    err = float(jnp.max(jnp.abs(out - ref)))
    assert err < 1e-5, err

    print("KERNEL_OK")
</pallas_src>

<mosaic_0001>
module attributes {stable_mosaic.version = 11 : i64} {
  func.func @_head_kernel(%arg0: i32, %arg1: i32, %arg2: memref<1x1x18x130xf32, #tpu.memory_space<vmem>>, %arg3: memref<36xf32, #tpu.memory_space<smem>>, %arg4: memref<1xf32, #tpu.memory_space<smem>>, %arg5: memref<1x16x128xf32, #tpu.memory_space<vmem>>) attributes {dimension_semantics = [#tpu.dimension_semantics<parallel>, #tpu.dimension_semantics<arbitrary>], iteration_bounds = array<i64: 2, 4>, scalar_prefetch = 0 : i64, scratch_operands = 0 : i64, tpu.core_type = #tpu.core_type<tc>, window_params = [{transform_indices = @transform_0, window_bounds = array<i64: 1, 1, 18, 130>}, {transform_indices = @transform_1, window_bounds = array<i64: 36>}, {transform_indices = @transform_2, window_bounds = array<i64: 1>}, {transform_indices = @transform_3, window_bounds = array<i64: 1, 16, 128>}]} {
    %c9_i32 = arith.constant 9 : i32
    %0 = arith.muli %arg1, %c9_i32 : i32
    %c0_i32 = arith.constant 0 : i32
    %1 = arith.addi %0, %c0_i32 : i32
    %2 = arith.index_cast %1 : i32 to index
    %3 = memref.load %arg3[%2] : memref<36xf32, #tpu.memory_space<smem>>
    %c1_i32 = arith.constant 1 : i32
    %4 = arith.addi %0, %c1_i32 : i32
    %5 = arith.index_cast %4 : i32 to index
    %6 = memref.load %arg3[%5] : memref<36xf32, #tpu.memory_space<smem>>
    %c2_i32 = arith.constant 2 : i32
    %7 = arith.addi %0, %c2_i32 : i32
    %8 = arith.index_cast %7 : i32 to index
    %9 = memref.load %arg3[%8] : memref<36xf32, #tpu.memory_space<smem>>
    %c3_i32 = arith.constant 3 : i32
    %10 = arith.addi %0, %c3_i32 : i32
    %11 = arith.index_cast %10 : i32 to index
    %12 = memref.load %arg3[%11] : memref<36xf32, #tpu.memory_space<smem>>
    %c4_i32 = arith.constant 4 : i32
    %13 = arith.addi %0, %c4_i32 : i32
    %14 = arith.index_cast %13 : i32 to index
    %15 = memref.load %arg3[%14] : memref<36xf32, #tpu.memory_space<smem>>
    %c5_i32 = arith.constant 5 : i32
    %16 = arith.addi %0, %c5_i32 : i32
    %17 = arith.index_cast %16 : i32 to index
    %18 = memref.load %arg3[%17] : memref<36xf32, #tpu.memory_space<smem>>
    %c6_i32 = arith.constant 6 : i32
    %19 = arith.addi %0, %c6_i32 : i32
    %20 = arith.index_cast %19 : i32 to index
    %21 = memref.load %arg3[%20] : memref<36xf32, #tpu.memory_space<smem>>
    %c7_i32 = arith.constant 7 : i32
    %22 = arith.addi %0, %c7_i32 : i32
    %23 = arith.index_cast %22 : i32 to index
    %24 = memref.load %arg3[%23] : memref<36xf32, #tpu.memory_space<smem>>
    %c8_i32 = arith.constant 8 : i32
    %25 = arith.addi %0, %c8_i32 : i32
    %26 = arith.index_cast %25 : i32 to index
    %27 = memref.load %arg3[%26] : memref<36xf32, #tpu.memory_space<smem>>
    %cst = arith.constant 0.000000e+00 : f32
    %28 = vector.broadcast %cst : f32 to vector<16x128xf32>
    %c0 = arith.constant 0 : index
    %c0_0 = arith.constant 0 : index
    %c0_1 = arith.constant 0 : index
    %c0_2 = arith.constant 0 : index
    %29 = vector.load %arg2[%c0, %c0_0, %c0_1, %c0_2] : memref<1x1x18x130xf32, #tpu.memory_space<vmem>>, vector<1x1x16x128xf32>
    %30 = vector.shape_cast %29 : vector<1x1x16x128xf32> to vector<16x128xf32>
    %31 = vector.broadcast %3 : f32 to vector<16x128xf32>
    %32 = arith.mulf %30, %31 : vector<16x128xf32>
    %33 = arith.addf %28, %32 : vector<16x128xf32>
    %c0_3 = arith.constant 0 : index
    %c0_4 = arith.constant 0 : index
    %c0_5 = arith.constant 0 : index
    %c1 = arith.constant 1 : index
    %34 = vector.load %arg2[%c0_3, %c0_4, %c0_5, %c1] : memref<1x1x18x130xf32, #tpu.memory_space<vmem>>, vector<1x1x16x128xf32>
    %35 = vector.shape_cast %34 : vector<1x1x16x128xf32> to vector<16x128xf32>
    %36 = vector.broadcast %6 : f32 to vector<16x128xf32>
    %37 = arith.mulf %35, %36 : vector<16x128xf32>
    %38 = arith.addf %33, %37 : vector<16x128xf32>
    %c0_6 = arith.constant 0 : index
    %c0_7 = arith.constant 0 : index
    %c0_8 = arith.constant 0 : index
    %c2 = arith.constant 2 : index
    %39 = vector.load %arg2[%c0_6, %c0_7, %c0_8, %c2] : memref<1x1x18x130xf32, #tpu.memory_space<vmem>>, vector<1x1x16x128xf32>
    %40 = vector.shape_cast %39 : vector<1x1x16x128xf32> to vector<16x128xf32>
    %41 = vector.broadcast %9 : f32 to vector<16x128xf32>
    %42 = arith.mulf %40, %41 : vector<16x128xf32>
    %43 = arith.addf %38, %42 : vector<16x128xf32>
    %c0_9 = arith.constant 0 : index
    %c0_10 = arith.constant 0 : index
    %c1_11 = arith.constant 1 : index
    %c0_12 = arith.constant 0 : index
    %44 = vector.load %arg2[%c0_9, %c0_10, %c1_11, %c0_12] : memref<1x1x18x130xf32, #tpu.memory_space<vmem>>, vector<1x1x16x128xf32>
    %45 = vector.shape_cast %44 : vector<1x1x16x128xf32> to vector<16x128xf32>
    %46 = vector.broadcast %12 : f32 to vector<16x128xf32>
    %47 = arith.mulf %45, %46 : vector<16x128xf32>
    %48 = arith.addf %43, %47 : vector<16x128xf32>
    %c0_13 = arith.constant 0 : index
    %c0_14 = arith.constant 0 : index
    %c1_15 = arith.constant 1 : index
    %c1_16 = arith.constant 1 : index
    %49 = vector.load %arg2[%c0_13, %c0_14, %c1_15, %c1_16] : memref<1x1x18x130xf32, #tpu.memory_space<vmem>>, vector<1x1x16x128xf32>
    %50 = vector.shape_cast %49 : vector<1x1x16x128xf32> to vector<16x128xf32>
    %51 = vector.broadcast %15 : f32 to vector<16x128xf32>
    %52 = arith.mulf %50, %51 : vector<16x128xf32>
    %53 = arith.addf %48, %52 : vector<16x128xf32>
    %c0_17 = arith.constant 0 : index
    %c0_18 = arith.constant 0 : index
    %c1_19 = arith.constant 1 : index
    %c2_20 = arith.constant 2 : index
    %54 = vector.load %arg2[%c0_17, %c0_18, %c1_19, %c2_20] : memref<1x1x18x130xf32, #tpu.memory_space<vmem>>, vector<1x1x16x128xf32>
    %55 = vector.shape_cast %54 : vector<1x1x16x128xf32> to vector<16x128xf32>
    %56 = vector.broadcast %18 : f32 to vector<16x128xf32>
    %57 = arith.mulf %55, %56 : vector<16x128xf32>
    %58 = arith.addf %53, %57 : vector<16x128xf32>
    %c0_21 = arith.constant 0 : index
    %c0_22 = arith.constant 0 : index
    %c2_23 = arith.constant 2 : index
    %c0_24 = arith.constant 0 : index
    %59 = vector.load %arg2[%c0_21, %c0_22, %c2_23, %c0_24] : memref<1x1x18x130xf32, #tpu.memory_space<vmem>>, vector<1x1x16x128xf32>
    %60 = vector.shape_cast %59 : vector<1x1x16x128xf32> to vector<16x128xf32>
    %61 = vector.broadcast %21 : f32 to vector<16x128xf32>
    %62 = arith.mulf %60, %61 : vector<16x128xf32>
    %63 = arith.addf %58, %62 : vector<16x128xf32>
    %c0_25 = arith.constant 0 : index
    %c0_26 = arith.constant 0 : index
    %c2_27 = arith.constant 2 : index
    %c1_28 = arith.constant 1 : index
    %64 = vector.load %arg2[%c0_25, %c0_26, %c2_27, %c1_28] : memref<1x1x18x130xf32, #tpu.memory_space<vmem>>, vector<1x1x16x128xf32>
    %65 = vector.shape_cast %64 : vector<1x1x16x128xf32> to vector<16x128xf32>
    %66 = vector.broadcast %24 : f32 to vector<16x128xf32>
    %67 = arith.mulf %65, %66 : vector<16x128xf32>
    %68 = arith.addf %63, %67 : vector<16x128xf32>
    %c0_29 = arith.constant 0 : index
    %c0_30 = arith.constant 0 : index
    %c2_31 = arith.constant 2 : index
    %c2_32 = arith.constant 2 : index
    %69 = vector.load %arg2[%c0_29, %c0_30, %c2_31, %c2_32] : memref<1x1x18x130xf32, #tpu.memory_space<vmem>>, vector<1x1x16x128xf32>
    %70 = vector.shape_cast %69 : vector<1x1x16x128xf32> to vector<16x128xf32>
    %71 = vector.broadcast %27 : f32 to vector<16x128xf32>
    %72 = arith.mulf %70, %71 : vector<16x128xf32>
    %73 = arith.addf %68, %72 : vector<16x128xf32>
    %c0_i32_33 = arith.constant 0 : i32
    %74 = arith.cmpi eq, %arg1, %c0_i32_33 : i32
    %75 = arith.extui %74 : i1 to i32
    %c0_i32_34 = arith.constant 0 : i32
    %76 = arith.cmpi ne, %75, %c0_i32_34 : i32
    scf.if %76 {
      %c0_39 = arith.constant 0 : index
      %83 = memref.load %arg4[%c0_39] : memref<1xf32, #tpu.memory_space<smem>>
      %84 = vector.broadcast %83 : f32 to vector<16x128xf32>
      %85 = arith.addf %73, %84 : vector<16x128xf32>
      %c0_40 = arith.constant 0 : index
      %c0_41 = arith.constant 0 : index
      %c0_42 = arith.constant 0 : index
      %86 = vector.load %arg5[%c0_40, %c0_41, %c0_42] : memref<1x16x128xf32, #tpu.memory_space<vmem>>, vector<1x16x128xf32>
      %87 = vector.shape_cast %86 : vector<1x16x128xf32> to vector<16x128xf32>
      %88 = vector.shape_cast %85 : vector<16x128xf32> to vector<1x16x128xf32>
      tpu.vector_store %arg5[%c0_40, %c0_41, %c0_42], %88 {strides = array<i32>} : memref<1x16x128xf32, #tpu.memory_space<vmem>>, vector<1x16x128xf32>,
    } else {
    }
    %c0_i32_35 = arith.constant 0 : i32
    %77 = arith.cmpi sgt, %arg1, %c0_i32_35 : i32
    %78 = arith.extui %77 : i1 to i32
    %c0_i32_36 = arith.constant 0 : i32
    %79 = arith.cmpi ne, %78, %c0_i32_36 : i32
    scf.if %79 {
      %c0_39 = arith.constant 0 : index
      %c0_40 = arith.constant 0 : index
      %c0_41 = arith.constant 0 : index
      %83 = vector.load %arg5[%c0_39, %c0_40, %c0_41] : memref<1x16x128xf32, #tpu.memory_space<vmem>>, vector<1x16x128xf32>
      %84 = vector.shape_cast %83 : vector<1x16x128xf32> to vector<16x128xf32>
      %85 = arith.addf %84, %73 : vector<16x128xf32>
      %c0_42 = arith.constant 0 : index
      %c0_43 = arith.constant 0 : index
      %c0_44 = arith.constant 0 : index
      %86 = vector.load %arg5[%c0_42, %c0_43, %c0_44] : memref<1x16x128xf32, #tpu.memory_space<vmem>>, vector<1x16x128xf32>
      %87 = vector.shape_cast %86 : vector<1x16x128xf32> to vector<16x128xf32>
      %88 = vector.shape_cast %85 : vector<16x128xf32> to vector<1x16x128xf32>
      tpu.vector_store %arg5[%c0_42, %c0_43, %c0_44], %88 {strides = array<i32>} : memref<1x16x128xf32, #tpu.memory_space<vmem>>, vector<1x16x128xf32>,
    } else {
    }
    %c3_i32_37 = arith.constant 3 : i32
    %80 = arith.cmpi eq, %arg1, %c3_i32_37 : i32
    %81 = arith.extui %80 : i1 to i32
    %c0_i32_38 = arith.constant 0 : i32
    %82 = arith.cmpi ne, %81, %c0_i32_38 : i32
    scf.if %82 {
      %c0_39 = arith.constant 0 : index
      %c0_40 = arith.constant 0 : index
      %c0_41 = arith.constant 0 : index
      %83 = vector.load %arg5[%c0_39, %c0_40, %c0_41] : memref<1x16x128xf32, #tpu.memory_space<vmem>>, vector<1x16x128xf32>
      %84 = vector.shape_cast %83 : vector<1x16x128xf32> to vector<16x128xf32>
      %85 = arith.negf %84 : vector<16x128xf32>
      %86 = math.exp %85 : vector<16x128xf32>
      %cst_42 = arith.constant 1.000000e+00 : f32
      %87 = vector.broadcast %cst_42 : f32 to vector<16x128xf32>
      %88 = arith.addf %87, %86 : vector<16x128xf32>
      %89 = arith.divf %87, %88 : vector<16x128xf32>
      %c0_43 = arith.constant 0 : index
      %c0_44 = arith.constant 0 : index
      %c0_45 = arith.constant 0 : index
      %90 = vector.load %arg5[%c0_43, %c0_44, %c0_45] : memref<1x16x128xf32, #tpu.memory_space<vmem>>, vector<1x16x128xf32>
      %91 = vector.shape_cast %90 : vector<1x16x128xf32> to vector<16x128xf32>
      %92 = vector.shape_cast %89 : vector<16x128xf32> to vector<1x16x128xf32>
      tpu.vector_store %arg5[%c0_43, %c0_44, %c0_45], %92 {strides = array<i32>} : memref<1x16x128xf32, #tpu.memory_space<vmem>>, vector<1x16x128xf32>,
    } else {
    }
    return
  }
  func.func @transform_0(%arg0: i32, %arg1: i32) -> (i32, i32, i32, i32) {
    %c0_i32 = arith.constant 0 : i32
    %c0_i32_0 = arith.constant 0 : i32
    %c0_i32_1 = arith.constant 0 : i32
    return %arg0, %arg1, %c0_i32, %c0_i32_0 : i32, i32, i32, i32
  }
  func.func @transform_1(%arg0: i32, %arg1: i32) -> i32 {
    %c0_i32 = arith.constant 0 : i32
    %c0_i32_0 = arith.constant 0 : i32
    return %c0_i32 : i32
  }
  func.func @transform_2(%arg0: i32, %arg1: i32) -> i32 {
    %c0_i32 = arith.constant 0 : i32
    %c0_i32_0 = arith.constant 0 : i32
    return %c0_i32 : i32
  }
  func.func @transform_3(%arg0: i32, %arg1: i32) -> (i32, i32, i32) {
    %c0_i32 = arith.constant 0 : i32
    %c0_i32_0 = arith.constant 0 : i32
    %c0_i32_1 = arith.constant 0 : i32
    return %arg0, %c0_i32, %c0_i32_0 : i32, i32, i32
  }
}

</mosaic_0001>

<bundles_post_ra>
// kernel: tpu_custom_call.1
= control target key start
LH: loop header
LB: loop body
LE: loop exit
PB: predicated region body
PF: predicated region fallthrough
CT: control target
= control target key end

     0   :  { %s1181_s0 = inlined_call_operand.vmem [shape: f32[2,4,18,130], index: 0, kind: input, shape index: {}]   ;;  %s1182_s1 = inlined_call_operand.vmem [shape: f32[36], index: 1, kind: input, shape index: {}]   ;;  %s1183_s2 = inlined_call_operand.<no memory space> [shape: f32[1], index: 2, kind: input, shape index: {}]   ;;  %s1184_s3 = inlined_call_operand.hbm [shape: f32[2,16,128], index: 3, kind: output, shape index: {}]  }
   0x1   :  { %8 = sst [smem:[#allocation2]] %s1183_s2 }
   0x2   :  { %9 = vsyncpa [#allocation5], 0 }
   0x3   :  { %10 = vsyncpa [#allocation4], 0 }
   0x4   :  { %12 = vsyncpa [#allocation4 + $0x1], 0  ;;  %s910_s14 = smov 0   ;;  %s912_s15 = smov 0  }
   0x5   :  { %s914_s16 = smov 0   ;;  %s916_s17 = smov 0  }
   0x6   :  { %s918_s18 = smov 0   ;;  %s920_s19 = smov 0  }
   0x7   :  { %s922_s20 = smov 0   ;;  %s924_s21 = smov 0  }
   0x8 LB: > { %s651_s2 = sadd.s32 4294967295, %s880_s21   ;;  %s652_s22 = sadd.s32 4294967294, %s880_s21   ;;  %s880_s21 = sphi %s924_s21, %s18_s21   ;;  %s876_s20 = sphi %s922_s20, %s1193_s20   ;;  %s872_s19 = sphi %s920_s19, %s1192_s19   ;;  %s868_s18 = sphi %s918_s18, %s1191_s18   ;;  %s864_s17 = sphi %s916_s17, %s1190_s17   ;;  %s860_s16 = sphi %s914_s16, %s1189_s16   ;;  %s856_s15 = sphi %s912_s15, %s1188_s15   ;;  %s852_s14 = sphi %s910_s14, %s1187_s14  }
   0x9   : > { %s27_s23 = sadd.s32 1, %s872_s19  ;;  %s30_s24 = sadd.s32 1, %s876_s20 }
   0xa   : > { %p28_p0 = scmp.ge.s32.totalorder %s27_s23, 4  ;;  %s107_s25 = sadd.s32 1, %s860_s16 }
   0xb   : > { %p117_p1 = scmp.ne.s32.totalorder %s860_s16, %s856_s15  ;;  %p118_p2 = scmp.eq.s32.totalorder %s651_s2, 7 }
   0xc   : > { %s1195_s23 = smov (%p28_p0, %s27_s23), 0  ;;  %s1197_s24 = smov (!%p28_p0, %s30_s24), %s876_s20 }
   0xd   : > { %p960_p3 = por %p118_p2, %p117_p1  ;;  %p123_p4 = scmp.ne.s32.totalorder %s856_s15, %s852_s14 }
   0xe   : > { %p32_p5 = scmp.ge.s32.totalorder %s1197_s24, 2  ;;  %p124_p6 = scmp.eq.s32.totalorder %s652_s22, 7 }
   0xf   : > { %p653_p7 = scmp.ge.s32.totalorder %s880_s21, 1  ;;  %p131_p8 = scmp.lt.s32.totalorder %s880_s21, 9 }
  0x10   : > { %s1199_s24 = smov (%p32_p5, %s1197_s24), 0  ;;  %p970_p9 = por %p124_p6, %p123_p4 }
  0x11   : > { %p132_p10 = pnand %p653_p7, %p131_p8  ;;  %s104_s28 = ssub.s32 %s876_s20, %s1199_s24 }
  0x12   : > { %p105_p11 = scmp.eq.s32.totalorder %s104_s28, 0  ;;  %p687_p13 = scmp.eq.s32.totalorder %s651_s2, 0 }
  0x13   : > { %p679_p12 = pneg %p132_p10  ;;  %s143_s4 = sshll.u32 %s1182_s1, 4  ;;  %s144_s4 = int_to_ptr.vmem [resolvable:$true] %s143_s4 }
  0x14   : > { %s980_s5 = scalar_select %p105_p11, %s860_s16, %s107_s25  }
  0x15   : > { %p680_p0 = pnand %p687_p13, %p679_p12  ;;  %s882_s6 = smov [#allocation3]  }
  0x16   : > { %171 = sbr.rel (%p132_p10) target bundleno = 288 (0x120), region = 32 }
  0x17   : > { %682 = dma.vmem_to_smem (!%p680_p0), %s144_s4, 16, %s882_s6, [#allocation5]  }
  0x1b   : > { %843 = dma.done.wait (%p687_p13), [#allocation5], 16  }
  0x1c   : > { %845 = vsyncadd (%p687_p13), [#allocation5], 4294967280 }
  0x1d   : > { %178 = sfence }
  0x1e   : > { %p201_p1 = scmp.lt.s32.totalorder %s868_s18, 1  ;;  %p203_p2 = scmp.lt.s32.totalorder %s864_s17, 3  ;;  %vm294_vm0 = vcmask 1046528   ;;  %vm389_vm1 = vcmask 1045504   ;;  %vm254_vm2 = vcmask 1039360   ;;  %vm278_vm3 = vcmask 1031168  }
  0x1f   : > { %s985_s7 = smul.u32 9, %s864_s17  ;;  %p660_p4 = scmp.ne.s32.totalorder %s864_s17, 0 }
  0x20   : > { %s202_s8 = scalar_select %p201_p1, %s868_s18, 1 }
  0x21   : > { %s204_s9 = scalar_select %p203_p2, %s864_s17, 3 }
  0x22   : > { %s672_s10 = smul.u32 24, %s202_s8  ;;  %s212_s11 = sadd.s32 1, %s985_s7 }
  0x23   : > { %s671_s12 = smul.u32 6, %s204_s9  ;;  %s213_s13 = sld [smem:[#allocation3 + %s212_s11]] }
  0x24   : > { %s214_s2 = sadd.s32 2, %s985_s7  ;;  %s218_s6 = sadd.s32 4, %s985_s7 }
  0x25   : > { %s207_s22 = sadd.s32 %s672_s10, %s671_s12  ;;  %s215_s25 = sld [smem:[#allocation3 + %s214_s2]] }
  0x26   : > { %s659_s28 = sshll.u32 %s207_s22, 3  ;;  %s219_s8 = sld [smem:[#allocation3 + %s218_s6]] }
  0x27   : > { %s994_s4 = scalar_lea.vmem %s1181_s0, %s659_s28  ;;  %s883_s9 = smov 127  }
  0x28   : > { %v998_v0 = vld [vmem:[%s994_s4 + $0x10] sm:$0xff]  ;;  %v1001_v1 = vld [vmem:[%s994_s4] sm:$0xff]  ;;  %v1009_v7 = vld [vmem:[%s994_s4 + $0x18] sm:$0xff]  ;;  %s884_s10 = smov 126   ;;  %s220_s11 = sadd.s32 5, %s985_s7 }
  0x29   : > { %v237_v2 = vstv %s213_s13  ;;  %v235_v8 = vld [vmem:[%s994_s4 + $0x8] sm:$0xff]  ;;  %v1016_v13 = vld [vmem:[%s994_s4] sm:$0xfe]  ;;  %s221_s12 = sld [smem:[#allocation3 + %s220_s11]]  ;;  %v1023_v16 = vld [vmem:[%s994_s4 + $0x20] sm:$0x1] }
  0x2a   : > { %v240_v3 = vmul.f32 %v237_v2, %v998_v0  ;;  %v238_v4 = vmul.f32 %v237_v2, %v1001_v1  ;;  %v241_v9 = vmul.f32 %v237_v2, %v1009_v7  ;;  %v239_v10 = vmul.f32 %v237_v2, %v235_v8  ;;  %v304_v17 = vld [vmem:[%s994_s4 + $0x8] sm:$0xfe]  ;;  %s224_s13 = sadd.s32 7, %s985_s7  ;;  %v305_v25 = vld [vmem:[%s994_s4 + $0x28] sm:$0x1]  ;;  %s226_s22 = sadd.s32 8, %s985_s7 }
  0x2b   : > { %v261_v5 = vstv %s215_s25  ;;  %s225_s2 = sld [smem:[#allocation3 + %s224_s13]]  ;;  %v1047_v46 = vld [vmem:[%s994_s4] sm:$0xfc]  ;;  %v399_v53 = vld [vmem:[%s994_s4 + $0x8] sm:$0xfc]  ;;  %s198_s28 = sand.u32 1, %s856_s15  }
  0x2c   : > { %250 = vrot.lane.b32.xlu1 %v240_v3, %s883_s9  ;;  %246 = vrot.lane.b32.xlu0 %v238_v4, %s883_s9  ;;  %v262_v6 = vmul.f32 %v261_v5, %v1001_v1  ;;  %v306_v11 = vstv %s219_s8  ;;  %v263_v12 = vmul.f32 %v261_v5, %v235_v8  ;;  %v265_v19 = vmul.f32 %v261_v5, %v1009_v7  ;;  %s227_s25 = sld [smem:[#allocation3 + %s226_s22]]  ;;  %v400_v56 = vld [vmem:[%s994_s4 + $0x28] sm:$0x3]  ;;  %s1077_s29 = sshll.u32 %s198_s28, 4 }
  0x2d   : > { %v307_v14 = vmul.f32 %v306_v11, %v1016_v13  ;;  %v309_v15 = vmul.f32 %v306_v11, %v998_v0  ;;  %v264_v20 = vmul.f32 %v261_v5, %v998_v0  ;;  %v311_v21 = vmul.f32 %v306_v11, %v1023_v16  ;;  %v1062_v61 = vld [vmem:[%s994_s4 + $0x20] sm:$0x3]  ;;  %s216_s30 = sadd.s32 3, %s985_s7  ;;  %s211_s4 = sld [smem:[#allocation3 + %s985_s7]] }
  0x2e   : > { %270 = vrot.lane.b32.xlu2 %v262_v6, %s884_s10  ;;  %v308_v23 = vmul.f32 %v306_v11, %v304_v17  ;;  %v310_v24 = vmul.f32 %v306_v11, %v1009_v7  ;;  %v312_v27 = vmul.f32 %v306_v11, %v305_v25  ;;  %s217_s6 = sld [smem:[#allocation3 + %s216_s30]]  ;;  %s222_s8 = sadd.s32 6, %s985_s7 }
  0x2f   : > { %v319_v18 = vrot.slane %v307_v14, 1  ;;  %v320_v22 = vrot.slane %v309_v15, 1  ;;  %v325_v28 = vrot.slane %v311_v21, 1  ;;  %v343_v31 = vstv %s221_s12  ;;  %s1121_s7 = scalar_lea.vmem [#allocation6], %s1077_s29 }
  0x30   : > { %v322_v29 = vrot.slane %v308_v23, 1  ;;  %v323_v30 = vrot.slane %v310_v24, 1  ;;  %v327_v32 = vrot.slane %v312_v27, 1  ;;  %v345_v33 = vmul.f32 %v343_v31, %v304_v17 }
  0x31   : > { %v321_v26 = vsel %vm294_vm0, %v319_v18, %v320_v22  ;;  %v347_v34 = vmul.f32 %v343_v31, %v1009_v7  ;;  %v326_v35 = vsel %vm294_vm0, %v320_v22, %v325_v28  ;;  %v344_v37 = vmul.f32 %v343_v31, %v1016_v13 }
  0x32   : > { %v324_v36 = vsel %vm294_vm0, %v322_v29, %v323_v30  ;;  %v346_v38 = vmul.f32 %v343_v31, %v998_v0  ;;  %v328_v39 = vsel %vm294_vm0, %v323_v30, %v327_v32  ;;  %v348_v40 = vmul.f32 %v343_v31, %v1023_v16 }
  0x33   : > { %v401_v41 = vstv %s225_s2  ;;  %v359_v42 = vrot.slane %v345_v33, 1  ;;  %v360_v43 = vrot.slane %v347_v34, 1  ;;  %v356_v44 = vrot.slane %v344_v37, 1 }
  0x34   : > { %252 = vrot.lane.b32.xlu1 %v241_v9, %s883_s9  ;;  %248 = vrot.lane.b32.xlu0 %v239_v10, %s883_s9  ;;  %v357_v45 = vrot.slane %v346_v38, 1  ;;  %v362_v47 = vrot.slane %v348_v40, 1  ;;  %v402_v48 = vmul.f32 %v401_v41, %v1047_v46  ;;  %v404_v51 = vmul.f32 %v401_v41, %v998_v0 }
  0x35   : > { %v361_v49 = vsel %vm294_vm0, %v359_v42, %v360_v43  ;;  %v349_v52 = vmul.f32 %v343_v31, %v305_v25  ;;  %v403_v55 = vmul.f32 %v401_v41, %v399_v53  ;;  %v405_v60 = vmul.f32 %v401_v41, %v1009_v7 }
  0x36   : > { %272 = vrot.lane.b32.xlu2 %v263_v12, %s884_s10  ;;  %v358_v50 = vsel %vm294_vm0, %v356_v44, %v357_v45  ;;  %v363_v54 = vsel %vm294_vm0, %v357_v45, %v362_v47  ;;  %v414_v57 = vrot.slane %v402_v48, 2  ;;  %v415_v58 = vrot.slane %v404_v51, 2 }
  0x37   : > { %v364_v59 = vrot.slane %v349_v52, 1  ;;  %v417_v62 = vrot.slane %v403_v55, 2  ;;  %v407_v63 = vmul.f32 %v401_v41, %v400_v56  ;;  %v406_v2 = vmul.f32 %v401_v41, %v1062_v61 }
  0x38   : > { %v416_v3 = vsel %vm389_vm1, %v414_v57, %v415_v58  ;;  %v418_v5 = vrot.slane %v405_v60, 2  ;;  %v438_v6 = vstv %s227_s25  ;;  %v287_v44 = vstv %s217_s6 }
  0x39   : > { %v365_v4 = vsel %vm294_vm0, %v360_v43, %v364_v59  ;;  %v439_v9 = vmul.f32 %v438_v6, %v1047_v46  ;;  %v422_v10 = vrot.slane %v407_v63, 2  ;;  %v420_v11 = vrot.slane %v406_v2, 2 }
  0x3a   : > { %v419_v8 = vsel %vm389_vm1, %v417_v62, %v418_v5  ;;  %v441_v12 = vmul.f32 %v438_v6, %v998_v0  ;;  %v443_v18 = vmul.f32 %v438_v6, %v1062_v61  ;;  %v442_v21 = vmul.f32 %v438_v6, %v1009_v7 }
  0x3b   : > { %v451_v14 = vrot.slane %v439_v9, 2  ;;  %v423_v15 = vsel %vm389_vm1, %v418_v5, %v422_v10  ;;  %v421_v17 = vsel %vm389_vm1, %v415_v58, %v420_v11  ;;  %v444_v23 = vmul.f32 %v438_v6, %v400_v56 }
  0x3c   : > { %276 = vrot.lane.b32.xlu1 %v265_v19, %s884_s10  ;;  %274 = vrot.lane.b32.xlu0 %v264_v20, %s884_s10  ;;  %v452_v19 = vrot.slane %v441_v12, 2  ;;  %v440_v20 = vmul.f32 %v438_v6, %v399_v53  ;;  %v457_v24 = vrot.slane %v443_v18, 2  ;;  %v230_v43 = vstv %s211_s4 }
  0x3d   : > { %v459_v27 = vrot.slane %v444_v23, 2  ;;  %v231_v48 = vmul.f32 %v230_v43, %v1001_v1  ;;  %v290_v52 = vmul.f32 %v287_v44, %v1023_v16  ;;  %v288_v53 = vmul.f32 %v287_v44, %v1016_v13 }
  0x3e   : > { %329 = vrot.lane.b32.xlu2 %v321_v26, %s883_s9  ;;  %v453_v22 = vsel %vm389_vm1, %v451_v14, %v452_v19  ;;  %v454_v25 = vrot.slane %v440_v20, 2  ;;  %v455_v26 = vrot.slane %v442_v21, 2  ;;  %v458_v28 = vsel %vm389_vm1, %v452_v19, %v457_v24 }
  0x3f   : > { %v298_v59 = vrot.slane %v290_v52, 1  ;;  %v295_v1 = vrot.slane %v288_v53, 1 }
  0x40   : > { %v456_v29 = vsel %vm389_vm1, %v454_v25, %v455_v26  ;;  %v460_v7 = vsel %vm389_vm1, %v455_v26, %v459_v27 }
  0x44   : > { %333 = vrot.lane.b32.xlu1 %v326_v35, %s883_s9  ;;  %331 = vrot.lane.b32.xlu0 %v324_v36, %s883_s9 }
  0x46   : > { %335 = vrot.lane.b32.xlu2 %v328_v39, %s883_s9 }
  0x4c   : > { %368 = vrot.lane.b32.xlu1 %v361_v49, %s884_s10  ;;  %366 = vrot.lane.b32.xlu0 %v358_v50, %s884_s10  ;;  %v289_v49 = vmul.f32 %v287_v44, %v998_v0 }
  0x4e   : > { %370 = vrot.lane.b32.xlu2 %v363_v54, %s884_s10  ;;  %v232_v54 = vmul.f32 %v230_v43, %v998_v0  ;;  %v296_v57 = vrot.slane %v289_v49, 1 }
  0x50   : > { %v299_v5 = vsel %vm294_vm0, %v296_v57, %v298_v59  ;;  %v297_v6 = vsel %vm294_vm0, %v295_v1, %v296_v57 }
  0x54   : > { %424 = vrot.lane.b32.xlu1 %v416_v3, %s883_s9  ;;  %372 = vrot.lane.b32.xlu0 %v365_v4, %s884_s10 }
  0x56   : > { %426 = vrot.lane.b32.xlu2 %v419_v8, %s883_s9 }
  0x5c   : > { %430 = vrot.lane.b32.xlu1 %v423_v15, %s883_s9  ;;  %428 = vrot.lane.b32.xlu0 %v421_v17, %s883_s9  ;;  %s223_s9 = sld [smem:[#allocation3 + %s222_s8]] }
  0x5e   : > { %461 = vrot.lane.b32.xlu2 %v453_v22, %s884_s10 }
  0x62   : > { %v382_v60 = vstv %s223_s9 }
  0x63   : > { %v383_v13 = vmul.f32 %v382_v60, %v1047_v46  ;;  %v384_v8 = vmul.f32 %v382_v60, %v998_v0  ;;  %v385_v9 = vmul.f32 %v382_v60, %v1062_v61 }
  0x64   : > { %465 = vrot.lane.b32.xlu1 %v458_v28, %s884_s10  ;;  %463 = vrot.lane.b32.xlu0 %v456_v29, %s884_s10 }
  0x65   : > { %v390_v17 = vrot.slane %v383_v13, 2  ;;  %v391_v19 = vrot.slane %v384_v8, 2  ;;  %v393_v20 = vrot.slane %v385_v9, 2 }
  0x66   : > { %467 = vrot.lane.b32.xlu2 %v460_v7, %s884_s10  ;;  %s479_s10 = sld [smem:[#allocation2]] (!%p660_p4) }
  0x67   : > { %v392_v25 = vsel %vm389_vm1, %v390_v17, %v391_v19  ;;  %v394_v26 = vsel %vm389_vm1, %v391_v19, %v393_v20 }
  0x88   : > { %v271_v30 = vpop.permute.xlu2 %270 }
  0x90   : > { %v273_v31 = vpop.permute.xlu2 %272 }
  0x91   : > { %v279_v3 = vsel %vm278_vm3, %v271_v30, %v273_v31 }
  0x98   : > { %v330_v34 = vpop.permute.xlu2 %329 }
  0x9e   : > { %v251_v32 = vpop.permute.xlu1 %250  ;;  %v247_v33 = vpop.permute.xlu0 %246 }
  0xa0   : > { %v336_v37 = vpop.permute.xlu2 %335 }
  0xa6   : > { %v253_v35 = vpop.permute.xlu1 %252  ;;  %v249_v36 = vpop.permute.xlu0 %248 }
  0xa7   : > { %v255_v51 = vsel %vm254_vm2, %v247_v33, %v249_v36  ;;  %v256_v55 = vsel %vm254_vm2, %v251_v32, %v253_v35 }
  0xa8   : > { %v371_v40 = vpop.permute.xlu2 %370  ;;  %v259_v56 = vadd.f32 %v255_v51, %v231_v48  ;;  %v260_v62 = vadd.f32 %v256_v55, %v232_v54 }
  0xaa   : > { %v283_v16 = vadd.f32 %v279_v3, %v259_v56 }
  0xac   : > { %v302_v15 = vadd.f32 %v297_v6, %v283_v16 }
  0xae   : > { %v277_v38 = vpop.permute.xlu1 %276  ;;  %v275_v39 = vpop.permute.xlu0 %274 }
  0xaf   : > { %v280_v58 = vsel %vm278_vm3, %v275_v39, %v277_v38 }
  0xb0   : > { %v427_v50 = vpop.permute.xlu2 %426  ;;  %v284_v4 = vadd.f32 %v280_v58, %v260_v62 }
  0xb2   : > { %v303_v14 = vadd.f32 %v299_v5, %v284_v4 }
  0xb6   : > { %v334_v41 = vpop.permute.xlu1 %333  ;;  %v332_v42 = vpop.permute.xlu0 %331 }
  0xb7   : > { %v338_v11 = vsel %vm254_vm2, %v334_v41, %v336_v37  ;;  %v337_v12 = vsel %vm254_vm2, %v330_v34, %v332_v42 }
  0xb8   : > { %v462_v10 = vpop.permute.xlu2 %461  ;;  %v342_v21 = vadd.f32 %v338_v11, %v303_v14  ;;  %v341_v22 = vadd.f32 %v337_v12, %v302_v15 }
  0xbe   : > { %v369_v45 = vpop.permute.xlu1 %368  ;;  %v367_v47 = vpop.permute.xlu0 %366 }
  0xbf   : > { %v374_v18 = vsel %vm278_vm3, %v367_v47, %v369_v45 }
  0xc0   : > { %v378_v24 = vadd.f32 %v374_v18, %v341_v22  ;;  %v468_v30 = vpop.permute.xlu2 %467 }
  0xc2   : > { %v397_v29 = vadd.f32 %v392_v25, %v378_v24 }
  0xc6   : > { %v425_v63 = vpop.permute.xlu1 %424  ;;  %v373_v2 = vpop.permute.xlu0 %372 }
  0xc7   : > { %v375_v46 = vsel %vm278_vm3, %v371_v40, %v373_v2  ;;  %v432_v27 = vsel %vm254_vm2, %v425_v63, %v427_v50 }
  0xc8   : > { %v379_v61 = vadd.f32 %v375_v46, %v342_v21  ;;  %v436_v31 = vadd.f32 %v432_v27, %v397_v29 }
  0xca   : > { %v398_v7 = vadd.f32 %v394_v26, %v379_v61 }
  0xce   : > { %v431_v23 = vpop.permute.xlu1 %430  ;;  %v429_v0 = vpop.permute.xlu0 %428 }
  0xcf   : > { %v433_v28 = vsel %vm254_vm2, %v429_v0, %v431_v23 }
  0xd0   : > { %v437_v32 = vadd.f32 %v433_v28, %v398_v7 }
  0xd4   : > { %478 = sbr.rel (%p660_p4) target bundleno = 222 (0xde), region = 40 }
  0xd6   : > { %v466_v33 = vpop.permute.xlu1 %465  ;;  %v464_v34 = vpop.permute.xlu0 %463 }
  0xd7   : > { %v470_v35 = vsel %vm278_vm3, %v466_v33, %v468_v30  ;;  %v469_v36 = vsel %vm278_vm3, %v462_v10, %v464_v34 }
  0xd8   : > { %v474_v37 = vadd.f32 %v470_v35, %v437_v32  ;;  %v473_v38 = vadd.f32 %v469_v36, %v436_v31 }
  0xd9   : > { %v480_v39 = vstv %s479_s10 }
  0xda   : > { %v481_v40 = vadd.f32 %v480_v39, %v473_v38  ;;  %v482_v41 = vadd.f32 %v480_v39, %v474_v37 }
  0xdc   : > { %483 = vst [vmem:[%s1121_s7] sm:$0xff] %v481_v40 }
  0xdd   : > { %484 = vst [vmem:[%s1121_s7 + $0x8] sm:$0xff] %v482_v41 }
  0xde PF: > { %p661_p5 = scmp.le.s32.totalorder %s864_s17, 0 }
  0xe0   : > { %488 = sbr.rel (%p661_p5) target bundleno = 234 (0xea), region = 44 }
  0xe5   : > { %v489_v42 = vld [vmem:[%s1121_s7] sm:$0xff]  ;;  %v490_v43 = vld [vmem:[%s1121_s7 + $0x8] sm:$0xff] }
  0xe6   : > { %v491_v44 = vadd.f32 %v489_v42, %v473_v38  ;;  %v492_v45 = vadd.f32 %v490_v43, %v474_v37 }
  0xe8   : > { %493 = vst [vmem:[%s1121_s7] sm:$0xff] %v491_v44 }
  0xe9   : > { %494 = vst [vmem:[%s1121_s7 + $0x8] sm:$0xff] %v492_v45 }
  0xea PF: > { %p662_p6 = scmp.ne.s32.totalorder %s864_s17, 3 }
  0xec   : > { %498 = sbr.rel (%p662_p6) target bundleno = 272 (0x110), region = 48 }
  0xf1   : > { %v499_v47 = vld [vmem:[%s1121_s7] sm:$0xff]  ;;  %v500_v48 = vld [vmem:[%s1121_s7 + $0x8] sm:$0xff] }
  0xf2   : > { %v663_v49 = vmul.f32 -1.442695, %v499_v47  ;;  %v664_v50 = vmul.f32 -1.442695, %v500_v48 }
  0xf4   : > { %759 = vpow2.f32 %v663_v49 }
  0xf5   : > { %761 = vpow2.f32 %v664_v50 }
  0xfa   : > { %v760_v51 = vpop.eup %759 }
  0xfb   : > { %v762_v52 = vpop.eup %761  ;;  %v507_v53 = vadd.f32 1.0, %v760_v51 }
  0xfc   : > { %v508_v54 = vadd.f32 1.0, %v762_v52 }
  0xfd   : > { %763 = vrcp.f32 %v507_v53  ;;  %vm514_vm4 = vweird.f32 %v507_v53  ;;  %v520_v58 = vand.u32 2147483648, %v507_v53  ;;  %v518_v60 = vand.u32 2147483647, %v507_v53 }
  0xfe   : > { %765 = vrcp.f32 %v508_v54  ;;  %v535_v62 = vand.u32 2147483648, %v508_v54  ;;  %vm529_vm6 = vweird.f32 %v508_v54  ;;  %v533_v2 = vand.u32 2147483647, %v508_v54 }
  0xff   : > { %v521_v16 = vor.u32 1.1754944e-38, %v520_v58  ;;  %vm519_vm9 = vcmp.eq.f32.partialorder %v518_v60, 8.507059e+37 }
 0x100   : > { %v536_v5 = vor.u32 1.1754944e-38, %v535_v62  ;;  %vm534_vm11 = vcmp.eq.f32.partialorder %v533_v2, 8.507059e+37 }
 0x103   : > { %v764_v55 = vpop.eup %763 }
 0x104   : > { %v766_v56 = vpop.eup %765  ;;  %v510_v57 = vmul.f32 %v764_v55, %v507_v53  ;;  %vm515_vm5 = vweird.f32 %v764_v55 }
 0x105   : > { %v525_v59 = vmul.f32 %v766_v56, %v508_v54  ;;  %vm530_vm7 = vweird.f32 %v766_v56  ;;  %vm516_vm8 = vmor %vm514_vm4, %vm515_vm5 }
 0x106   : > { %v511_v1 = vsub.f32 1.0, %v510_v57  ;;  %vm531_vm10 = vmor %vm529_vm6, %vm530_vm7 }
 0x107   : > { %v526_v63 = vsub.f32 1.0, %v525_v59 }
 0x108   : > { %v512_v3 = vmul.f32 %v764_v55, %v511_v1 }
 0x109   : > { %v527_v4 = vmul.f32 %v766_v56, %v526_v63 }
 0x10a   : > { %v513_v13 = vadd.f32 %v764_v55, %v512_v3 }
 0x10b   : > { %v528_v6 = vadd.f32 %v766_v56, %v527_v4 }
 0x10c   : > { %v517_v8 = vsel %vm516_vm8, %v764_v55, %v513_v13 }
 0x10d   : > { %v522_v9 = vsel %vm519_vm9, %v521_v16, %v517_v8  ;;  %v532_v10 = vsel %vm531_vm10, %v766_v56, %v528_v6 }
 0x10e   : > { %539 = vst [vmem:[%s1121_s7] sm:$0xff] %v522_v9  ;;  %v537_v11 = vsel %vm534_vm11, %v536_v5, %v532_v10 }
 0x10f   : > { %540 = vst [vmem:[%s1121_s7 + $0x8] sm:$0xff] %v537_v11 }
 0x110 PF: > { %s670_s17 = sshll.u32 %s868_s18, 4  ;;  %s554_s2 = sshll.u32 %s1121_s7, 4  ;;  %s555_s2 = int_to_ptr.vmem [resolvable:$true] %s554_s2 }
 0x111   : > { %s553_s13 = scalar_lea.hbm %s1184_s3, %s670_s17  ;;  %s542_s25 = scalar_lea.sflag [#allocation4], %s198_s28 }
 0x112   : > { %s556_s22 = sshll.u32 %s553_s13, 4  ;;  %s802_s18 = scalar_lea.hbm %s1184_s3, 32  ;;  %s557_s22 = int_to_ptr.hbm [resolvable:$true] %s556_s22 }
 0x113   : > { %s796_s29 = sshra.s32 %s557_s22, 4  ;;  %s797_s29 = int_to_ptr.hbm [resolvable:$true] %s796_s29 }
 0x114   : > { %s798_s30 = scalar_lea.hbm %s797_s29, 16  ;;  %p803_p11 = scmp.lt.s32.totalorder %s797_s29, %s1184_s3 }
 0x115   : > { %p799_p7 = scmp.ne.s32.totalorder %s797_s29, %s798_s30  ;;  %p804_p12 = scmp.lt.s32.totalorder %s802_s18, %s798_s30 }
 0x117   : > { %p800_p8 = pnand %p799_p7, %p960_p3  ;;  %p805_p13 = por %p804_p12, %p803_p11 }
 0x119   : > { %p801_p10 = pneg %p800_p8 }
 0x11b   : > { %p806_p0 = pnand %p805_p13, %p801_p10 }
 0x11d   : > { %809 = shalt.err (!%p806_p0)
}
 0x11e   : > { %s885_s28 = smov 128   ;;  %s886_s7 = smov 8  }
 0x11f   : > { %677 = dma.vmem_to_hbm [thread:$0]  (%p960_p3), %s555_s2, 256, %s557_s22, %s542_s25, %s885_s28, %s885_s28, %s886_s7  }
 0x120 PF: > { %p689_p1 = scmp.ge.s32.totalorder %s880_s21, 2  ;;  %s571_s10 = sand.u32 1, %s852_s14  }
 0x121   : > { %s572_s17 = scalar_lea.sflag [#allocation4], %s571_s10 }
 0x122   : > { %p684_p2 = pnand %p689_p1, %p970_p9 }
 0x124   : > { %p685_p4 = pneg %p684_p2 }
 0x126   : > { %847 = dma.done.wait (%p685_p4), %s572_s17, 256  }
 0x127   : > { %849 = vsyncadd (%p685_p4), %s572_s17, 4294967040  ;;  %s18_s21 = sadd.s32 1, %s880_s21   ;;  %s1187_s14 = smov %s856_s15 }
 0x128   : > { %p15_p5 = scmp.ge.s32.totalorder %s18_s21, 10   ;;  %s1188_s15 = smov %s860_s16 }
 0x129   : > { %s1189_s16 = smov %s980_s5  ;;  %s1190_s17 = smov %s872_s19 }
 0x12a   : > { %s1191_s18 = smov %s876_s20  ;;  %s1192_s19 = smov %s1195_s23 }
 0x12b   : > { %s1193_s20 = smov %s1199_s24  ;;  %17 = sbr.rel (!%p15_p5) target bundleno = 8 (0x8), region = 84 }
 0x130   :  { %578 = vsyncpa [#allocation4], 1 }
 0x131   :  { %580 = vsyncpa [#allocation4 + $0x1], 1 }
 0x132   :  { %581 = vsyncpa [#allocation5], 1 }
 0x133   :  { %583 = vsyncpa [#allocation5 + $0x1], 1 }

</bundles_post_ra>
